<compile_context>
chip_gen: v7x
topology: tpu7x:2x2x1
jax: 0.10.0
libtpu: 0.0.40
codegen_flags: <defaults>
</compile_context>

<pallas_src>
import functools

import jax
import jax.numpy as jnp
from jax.experimental import pallas as pl
from jax.experimental.pallas import tpu as pltpu

_LANE = 128
_SUBLANE = 8


def _round_up(v, m):
    return ((v + m - 1) // m) * m


def _vmem_capacity_bytes():
    """Physical VMEM per TensorCore; conservative 64 MiB (v7x) fallback."""
    try:
        cap = int(pltpu.get_tpu_info().vmem_capacity_bytes)
        if cap >= (32 << 20):
            return cap
    except Exception:
        pass
    return 64 << 20


def _seqwise_linear_kernel(x_ref, w_ref, b_ref, o_ref, *, compute_dtype):
    # x_ref: (TM, H_in)   streaming activation tile (original dtype)
    # w_ref: (H_in, TN_N) weight tile (resident across row tiles)
    # b_ref: (1, TN_N)    f32 bias tile
    # o_ref: (TM, TN_N)   output tile
    x = x_ref[...]
    if compute_dtype is not None and x.dtype != compute_dtype:
        # In-kernel cast: x is read from HBM once at its original width; no
        # wrapper-side cast pass (which would re-read + re-write all of x).
        x = x.astype(compute_dtype)
    acc = jnp.dot(x, w_ref[...], preferred_element_type=jnp.float32)
    o_ref[...] = (acc + b_ref[...]).astype(o_ref.dtype)  # f32 epilogue (v5e-safe)


def sequence_wise_linear(x, weight, bias, *, tm=512, compute_dtype=None,
                         out_dtype=None, force_pallas=False,
                         vmem_budget_bytes=None):
    """SequenceWise(nn.Linear): x (T, N, H_in) -> (T, N, H_out).

    weight: (H_in, H_out) [math convention, i.e. nn.Linear.weight.T], bias: (H_out,).
    compute_dtype: optional MXU dtype (e.g. jnp.bfloat16); accumulation stays f32.
    out_dtype: output dtype (defaults to x.dtype).
    """
    t, n, h_in = x.shape
    h_out = weight.shape[1]
    out_dtype = x.dtype if out_dtype is None else out_dtype

    if compute_dtype is not None:
        # Weight is small and resident: cast once here.  Activations are cast
        # per-tile inside the kernel.
        weight = weight.astype(compute_dtype)

    tn = t * n
    x2d = x.reshape(tn, h_in)  # contiguous collapse: metadata-only reshape

    # ---- Small-problem fallback: Pallas/grid overhead would dominate. -------
    if not force_pallas and tn * max(h_in, h_out) < (1 << 18):
        xs = x2d.astype(compute_dtype) if compute_dtype is not None else x2d
        acc = jnp.dot(xs, weight, preferred_element_type=jnp.float32) + bias
        return acc.astype(out_dtype).reshape(t, n, h_out)

    bias2d = bias.reshape(1, h_out).astype(jnp.float32)

    # ---- VMEM budget (real padded footprints, capped at physical VMEM). -----
    cap = _vmem_capacity_bytes()
    budget = max(cap - (16 << 20), cap // 2)        # leave compiler headroom
    if vmem_budget_bytes is not None:
        budget = min(budget, int(vmem_budget_bytes))

    in_sz = jnp.dtype(x2d.dtype).itemsize
    w_sz = jnp.dtype(weight.dtype).itemsize
    out_sz = jnp.dtype(out_dtype).itemsize
    cmp_sz = jnp.dtype(compute_dtype).itemsize if compute_dtype is not None else 0

    def w_slab(tnn):
        # Double-buffered weight + bias tiles, (8,128)-padded VMEM layout.
        w_b = _round_up(h_in, _SUBLANE) * _round_up(tnn, _LANE) * w_sz
        b_b = _SUBLANE * _round_up(tnn, _LANE) * 4
        return 2 * (w_b + b_b)

    def vmem_need(tm_, tnn_):
        x_b = tm_ * _round_up(h_in, _LANE) * in_sz        # lane-padded x tile
        o_b = tm_ * _round_up(tnn_, _LANE) * out_sz       # lane-padded out tile
        cast_b = tm_ * _round_up(h_in, _LANE) * cmp_sz    # in-kernel cast temp
        acc_b = tm_ * _round_up(tnn_, _LANE) * 4          # f32 accumulator
        return 2 * (x_b + o_b) + cast_b + acc_b + w_slab(tnn_)

    # H_out tile: keep the whole width resident if its slab is modest,
    # otherwise tile in multiples of 128 (keeps stores lane-dense) so the
    # resident weight fits comfortably even in v7x's 64 MiB VMEM.
    tnn = h_out
    if w_slab(tnn) > budget // 3:
        tnn = _round_up(h_out, _LANE)
        while tnn > _LANE and w_slab(tnn) > budget // 3:
            tnn = _round_up(max(_LANE, tnn // 2), _LANE)

    # Row tile: sublane-aligned; ensure >= 2 row tiles so both v7x TensorCores
    # get work; shrink until the footprint fits the budget.
    tm_eff = _round_up(
        max(_SUBLANE, min(tm, _round_up(pl.cdiv(tn, 2), _SUBLANE))), _SUBLANE)
    while tm_eff > _SUBLANE and vmem_need(tm_eff, tnn) > budget:
        tm_eff = _round_up(max(_SUBLANE, tm_eff // 2), _SUBLANE)

    need = vmem_need(tm_eff, tnn)
    vmem_limit = int(min(budget, need + max(need // 4, 2 << 20)))

    # Grid: H_out tiles OUTER (weight tile DMA'd once, reused over all row
    # tiles), row tiles INNER.  Ragged last blocks are masked by Pallas.
    grid_n = pl.cdiv(h_out, tnn)
    grid_m = pl.cdiv(tn, tm_eff)

    cost = pl.CostEstimate(
        flops=2 * tn * h_in * h_out,
        transcendentals=0,
        bytes_accessed=(tn * h_in * in_sz + h_in * h_out * w_sz
                        + h_out * 4 + tn * h_out * out_sz),
    )

    kernel = functools.partial(_seqwise_linear_kernel, compute_dtype=compute_dtype)

    out2d = pl.pallas_call(
        kernel,
        out_shape=jax.ShapeDtypeStruct((tn, h_out), out_dtype),
        grid_spec=pl.GridSpec(
            grid=(grid_n, grid_m),
            in_specs=[
                pl.BlockSpec((tm_eff, h_in), lambda j, i: (i, 0)),  # stream rows
                pl.BlockSpec((h_in, tnn), lambda j, i: (0, j)),     # weight tile
                pl.BlockSpec((1, tnn), lambda j, i: (0, j)),        # bias tile
            ],
            out_specs=pl.BlockSpec((tm_eff, tnn), lambda j, i: (i, j)),
        ),
        compiler_params=pltpu.CompilerParams(
            dimension_semantics=("parallel", "parallel"),  # independent tiles
            vmem_limit_bytes=vmem_limit,
        ),
        cost_estimate=cost,
    )(x2d, weight, bias2d)

    # Restore (T, N, H_out): contiguous reshape, no copy.
    return out2d.reshape(t, n, h_out)


if __name__ == "__main__":
    key = jax.random.PRNGKey(0)

    def make(k, T, N, HI, HO):
        kx, kw, kb = jax.random.split(k, 3)
        x = jax.random.normal(kx, (T, N, HI), dtype=jnp.float32)
        w = jax.random.normal(kw, (HI, HO), dtype=jnp.float32) * 0.1
        b = jax.random.normal(kb, (HO,), dtype=jnp.float32) * 0.1
        return x, w, b

    def ref(x, w, b):
        T, N, HI = x.shape
        HO = w.shape[1]
        y = jnp.dot(x.reshape(T * N, HI), w, preferred_element_type=jnp.float32) + b
        return y.astype(x.dtype).reshape(T, N, HO)

    k1, k2, k3 = jax.random.split(key, 3)

    # 1) Small shapes implied by the forward pass (T x N x H), Pallas forced.
    x, w, b = make(k1, 8, 2, 32, 32)
    out = jax.block_until_ready(sequence_wise_linear(x, w, b, force_pallas=True))
    assert out.shape == (8, 2, 32)
    assert jnp.allclose(out, ref(x, w, b), atol=1e-5, rtol=1e-5)

    # 2) Ragged rows (T*N=21 not a multiple of the row tile) + non-128 H_out.
    x2, w2, b2 = make(k2, 7, 3, 48, 200)
    out2 = jax.block_until_ready(sequence_wise_linear(x2, w2, b2, force_pallas=True))
    assert out2.shape == (7, 3, 200)
    assert jnp.allclose(out2, ref(x2, w2, b2), atol=1e-4, rtol=1e-4)

    # 3) bf16 MXU path (in-kernel activation cast, f32 accumulate): loose check.
    out_bf16 = jax.block_until_ready(
        sequence_wise_linear(x, w, b, compute_dtype=jnp.bfloat16, force_pallas=True))
    assert out_bf16.shape == (8, 2, 32)
    assert jnp.allclose(out_bf16, ref(x, w, b), atol=1e-1, rtol=1e-1)

    # 4) Force the tiled-H_out (2-D grid) path via an artificially small budget.
    x3, w3, b3 = make(k3, 4, 8, 256, 512)
    out3 = jax.block_until_ready(
        sequence_wise_linear(x3, w3, b3, force_pallas=True, vmem_budget_bytes=2 << 20))
    assert out3.shape == (4, 8, 512)
    assert jnp.allclose(out3, ref(x3, w3, b3), atol=1e-4, rtol=1e-4)

    # 5) Small-problem fallback (pure XLA) path still matches.
    out_fb = jax.block_until_ready(sequence_wise_linear(x, w, b))
    assert jnp.allclose(out_fb, ref(x, w, b), atol=1e-5, rtol=1e-5)

    # TODO(synk): the PyTorch try/except-ipdb debugging hook has no kernel equivalent.
    print("KERNEL_OK")
</pallas_src>

<mosaic_0001>
module attributes {stable_mosaic.version = 11 : i64} {
  func.func @_seqwise_linear_kernel(%arg0: i32, %arg1: i32, %arg2: memref<8x32xf32, #tpu.memory_space<vmem>>, %arg3: memref<32x32xf32, #tpu.memory_space<vmem>>, %arg4: memref<1x32xf32, #tpu.memory_space<vmem>>, %arg5: memref<8x32xf32, #tpu.memory_space<vmem>>) attributes {dimension_semantics = [#tpu.dimension_semantics<parallel>, #tpu.dimension_semantics<parallel>], iteration_bounds = array<i64: 1, 2>, scalar_prefetch = 0 : i64, scratch_operands = 0 : i64, tpu.core_type = #tpu.core_type<tc>, window_params = [{transform_indices = @transform_0, window_bounds = array<i64: 8, 32>}, {transform_indices = @transform_1, window_bounds = array<i64: 32, 32>}, {transform_indices = @transform_2, window_bounds = array<i64: 1, 32>}, {transform_indices = @transform_3, window_bounds = array<i64: 8, 32>}]} {
    %c0 = arith.constant 0 : index
    %c0_0 = arith.constant 0 : index
    %0 = vector.load %arg2[%c0, %c0_0] : memref<8x32xf32, #tpu.memory_space<vmem>>, vector<8x32xf32>
    %c0_1 = arith.constant 0 : index
    %c0_2 = arith.constant 0 : index
    %1 = vector.load %arg3[%c0_1, %c0_2] : memref<32x32xf32, #tpu.memory_space<vmem>>, vector<32x32xf32>
    %cst = arith.constant dense<0.000000e+00> : vector<8x32xf32>
    %2 = tpu.matmul %0, %1, %cst {dimension_numbers = #tpu.dot_dimension_numbers<[1], [0], [0], [1], [0, 0, 1, 1], [], []>} : vector<8x32xf32>, vector<32x32xf32>, vector<8x32xf32> -> vector<8x32xf32>
    %c0_3 = arith.constant 0 : index
    %c0_4 = arith.constant 0 : index
    %3 = vector.load %arg4[%c0_3, %c0_4] : memref<1x32xf32, #tpu.memory_space<vmem>>, vector<1x32xf32>
    %4 = vector.broadcast %3 : vector<1x32xf32> to vector<8x32xf32>
    %5 = arith.addf %2, %4 : vector<8x32xf32>
    %c0_5 = arith.constant 0 : index
    %c0_6 = arith.constant 0 : index
    %6 = vector.load %arg5[%c0_5, %c0_6] : memref<8x32xf32, #tpu.memory_space<vmem>>, vector<8x32xf32>
    tpu.vector_store %arg5[%c0_5, %c0_6], %5 {strides = array<i32>} : memref<8x32xf32, #tpu.memory_space<vmem>>, vector<8x32xf32>,
    return
  }
  func.func @transform_0(%arg0: i32, %arg1: i32) -> (i32, i32) {
    %c0_i32 = arith.constant 0 : i32
    %c0_i32_0 = arith.constant 0 : i32
    return %arg1, %c0_i32 : i32, i32
  }
  func.func @transform_1(%arg0: i32, %arg1: i32) -> (i32, i32) {
    %c0_i32 = arith.constant 0 : i32
    %c0_i32_0 = arith.constant 0 : i32
    return %c0_i32, %arg0 : i32, i32
  }
  func.func @transform_2(%arg0: i32, %arg1: i32) -> (i32, i32) {
    %c0_i32 = arith.constant 0 : i32
    %c0_i32_0 = arith.constant 0 : i32
    return %c0_i32, %arg0 : i32, i32
  }
  func.func @transform_3(%arg0: i32, %arg1: i32) -> (i32, i32) {
    %c0_i32 = arith.constant 0 : i32
    return %arg1, %arg0 : i32, i32
  }
}

</mosaic_0001>

<bundles_post_ra>
// kernel: tpu_custom_call.1
= control target key start
LH: loop header
LB: loop body
LE: loop exit
PB: predicated region body
PF: predicated region fallthrough
CT: control target
= control target key end

     0   :  { %8 = vsyncpa [#allocation3], 0  ;;  %s950_s0 = inlined_call_operand.hbm [shape: f32[16,32], index: 0, kind: input, shape index: {}]   ;;  %s951_s1 = inlined_call_operand.hbm [shape: f32[32,32], index: 1, kind: input, shape index: {}]   ;;  %s952_s2 = inlined_call_operand.vmem [shape: f32[1,32], index: 2, kind: input, shape index: {}]   ;;  %s953_s3 = inlined_call_operand.hbm [shape: f32[16,32], index: 3, kind: output, shape index: {}]  }
   0x1   :  { %10 = vsyncpa [#allocation3 + $0x1], 0 }
   0x2   :  { %11 = vsyncpa [#allocation6], 0 }
   0x3   :  { %12 = vsyncpa [#allocation4], 0 }
   0x4   :  { %14 = vsyncpa [#allocation4 + $0x1], 0  ;;  %s733_s12 = smov 0   ;;  %s735_s13 = smov 0  }
   0x5   :  { %s737_s14 = smov 0   ;;  %s739_s15 = smov 0  }
   0x6   :  { %s741_s16 = smov 0   ;;  %s743_s17 = smov 0  }
   0x7 LB: > { %s441_s18 = sadd.s32 4294967295, %s703_s17   ;;  %s442_s19 = sadd.s32 4294967294, %s703_s17   ;;  %s703_s17 = sphi %s743_s17, %s20_s17   ;;  %s699_s16 = sphi %s741_s16, %s977_s16   ;;  %s695_s15 = sphi %s739_s15, %s976_s15   ;;  %s691_s14 = sphi %s737_s14, %s975_s14   ;;  %s687_s13 = sphi %s735_s13, %s974_s13   ;;  %s683_s12 = sphi %s733_s12, %s973_s12  }
   0x8   : > { %p52_p0 = scmp.ne.s32.totalorder %s687_s13, %s683_s12  ;;  %p767_p1 = scmp.eq.s32.totalorder %s441_s18, 0 }
   0x9   : > { %p771_p2 = scmp.eq.s32.totalorder %s441_s18, 1  ;;  %p136_p3 = scmp.eq.s32.totalorder %s442_s19, 1 }
   0xa   : > { %s958_s20 = scalar_select %p767_p1, 1, 0 }
   0xb   : > { %s959_s21 = scalar_select %p771_p2, 1, 0 }
   0xc   : > { %p777_p4 = por %p767_p1, %p52_p0  ;;  %p443_p5 = scmp.ge.s32.totalorder %s703_s17, 1 }
   0xd   : > { %p782_p6 = por %p136_p3, %p52_p0  ;;  %p143_p7 = scmp.lt.s32.totalorder %s703_s17, 3 }
   0xe   : > { %s960_s22 = scalar_select %p777_p4, 1, 0 }
   0xf   : > { %s961_s23 = scalar_select %p782_p6, 1, 0 }
  0x10   : > { %p787_p8 = pnand %p443_p5, %p143_p7  ;;  %s705_s25 = smov [#allocation5]  }
  0x11   : > { %s157_s26 = sshll.u32 %s705_s25, 4  ;;  %s29_s28 = sadd.s32 1, %s699_s16  ;;  %s158_s26 = int_to_ptr.vmem [resolvable:$true] %s157_s26 }
  0x12   : > { %s962_s24 = scalar_select %p787_p8, 1, 0 }
  0x13   : > { %p489_p9 = pneg %p787_p8  ;;  %s559_s4 = scalar_lea.hbm %s951_s1, 512 }
  0x14   : > { %p560_p12 = scmp.ne.s32.totalorder %s951_s1, %s559_s4  ;;  %p566_p5 = scmp.lt.u32.totalorder %s559_s4, %s951_s1 }
  0x15   : > { %p796_p11 = pnand %p489_p9, %p767_p1 }
  0x17   : > { %p561_p13 = pneg %p796_p11 }
  0x19   : > { %p562_p0 = pnand %p561_p13, %p560_p12 }
  0x1b   : > { %p563_p3 = pneg %p562_p0 }
  0x1d   : > { %p568_p7 = pnand %p566_p5, %p563_p3 }
  0x1f   : > { %571 = shalt.err (!%p568_p7)
}
  0x20   : > { %s572_s9 = scalar_lea.vmem %s158_s26, 512  ;;  %p580_p1 = scmp.lt.s32.totalorder %s158_s26, %s158_s26 }
  0x21   : > { %p573_p9 = scmp.ne.s32.totalorder %s158_s26, %s572_s9  ;;  %p581_p4 = scmp.lt.s32.totalorder %s572_s9, %s572_s9 }
  0x23   : > { %p575_p10 = pnand %p573_p9, %p561_p13  ;;  %p582_p8 = por %p581_p4, %p580_p1 }
  0x25   : > { %p576_p6 = pneg %p575_p10 }
  0x27   : > { %p583_p2 = pnand %p582_p8, %p576_p6 }
  0x29   : > { %586 = shalt.err (!%p583_p2)
}
  0x2a   : > { %s706_s10 = smov 128   ;;  %s707_s11 = smov 8  }
  0x2b   : > { %492 = dma.hbm_to_vmem [thread:$0]  (!%p796_p11), %s951_s1, 512, %s158_s26, [#allocation6], %s706_s10, %s706_s10, %s707_s11  }
  0x2c   : > { %p30_p1 = scmp.ge.s32.totalorder %s29_s28, 2  ;;  %s39_s25 = sadd.s32 1, %s691_s14 }
  0x2d   : > { %p46_p2 = scmp.ne.s32.totalorder %s691_s14, %s687_s13  ;;  %p47_p4 = scmp.eq.s32.totalorder %s703_s17, 0 }
  0x2e   : > { %s979_s28 = smov (%p30_p1, %s29_s28), 0  ;;  %p965_p8 = scmp.ne.s32.totalorder %s959_s21, 0 }
  0x2f   : > { %p823_p6 = por %p47_p4, %p46_p2  ;;  %s36_s27 = ssub.s32 %s699_s16, %s979_s28 }
  0x30   : > { %p829_p10 = por %p965_p8, %p46_p2  ;;  %p502_p12 = scmp.lt.s32.totalorder %s703_s17, 2 }
  0x31   : > { %p37_p11 = scmp.eq.s32.totalorder %s36_s27, 0  ;;  %s177_s26 = sand.u32 1, %s691_s14  }
  0x32   : > { %s447_s4 = sshll.u32 %s177_s26, 3  ;;  %s448_s6 = sshll.u32 %s699_s16, 7 }
  0x33   : > { %s838_s5 = scalar_select %p37_p11, %s691_s14, %s39_s25  }
  0x34   : > { %s844_s9 = scalar_lea.hbm %s950_s0, %s448_s6  ;;  %s181_s21 = scalar_lea.vmem [#allocation2], %s447_s4 }
  0x35   : > { %s188_s10 = sshll.u32 %s181_s21, 4  ;;  %p850_p13 = pnand %p502_p12, %p823_p6  ;;  %s846_s10 = int_to_ptr.vmem [resolvable:$true] %s188_s10 }
  0x36   : > { %s178_s18 = scalar_lea.sflag [#allocation3], %s177_s26  ;;  %s587_s19 = scalar_lea.hbm %s844_s9, 128 }
  0x37   : > { %p588_p0 = scmp.ne.s32.totalorder %s844_s9, %s587_s19  ;;  %p589_p3 = pneg %p850_p13 }
  0x38   : > { %s592_s4 = scalar_lea.hbm %s950_s0, 256  ;;  %p593_p9 = scmp.lt.u32.totalorder %s844_s9, %s950_s0 }
  0x39   : > { %p590_p5 = pnand %p589_p3, %p588_p0  ;;  %p594_p1 = scmp.lt.u32.totalorder %s592_s4, %s587_s19 }
  0x3a   : > { %p596_p4 = scmp.lt.u32.totalorder %s587_s19, %s844_s9 }
  0x3b   : > { %p591_p7 = pneg %p590_p5  ;;  %p595_p2 = por %p594_p1, %p593_p9 }
  0x3d   : > { %p597_p6 = por %p596_p4, %p595_p2 }
  0x3f   : > { %p598_p8 = pnand %p597_p6, %p591_p7 }
  0x41   : > { %601 = shalt.err (!%p598_p8)
}
  0x42   : > { %s602_s26 = scalar_lea.vmem %s846_s10, 128  ;;  %s708_s7 = smov [#allocation2]  }
  0x43   : > { %p603_p12 = scmp.ne.s32.totalorder %s846_s10, %s602_s26  ;;  %s607_s8 = sshll.u32 %s708_s7, 4  ;;  %s608_s8 = int_to_ptr.vmem [resolvable:$false] %s607_s8 }
  0x44   : > { %s609_s21 = scalar_lea.vmem %s608_s8, 256  ;;  %p610_p5 = scmp.lt.s32.totalorder %s846_s10, %s608_s8 }
  0x45   : > { %p605_p11 = pnand %p603_p12, %p589_p3  ;;  %p611_p9 = scmp.lt.s32.totalorder %s609_s21, %s602_s26 }
  0x47   : > { %p606_p0 = pneg %p605_p11  ;;  %p612_p1 = por %p611_p9, %p610_p5 }
  0x49   : > { %p613_p2 = pnand %p612_p1, %p606_p0 }
  0x4b   : > { %616 = shalt.err (!%p613_p2)
}
  0x4c   : > { %496 = dma.hbm_to_vmem [thread:$0]  (!%p850_p13), %s844_s9, 128, %s846_s10, %s178_s18  }
  0x4d   : > { %p968_p7 = scmp.ne.s32.totalorder %s962_s24, 0 }
  0x4e   : > { %s882_s19 = sand.u32 (!%p968_p7), 1, %s687_s13   ;;  %p969_p3 = scmp.ne.s32.totalorder (!%p968_p7), %s960_s22, 0 }
  0x4f   : > { %197 = sbr.rel (%p968_p7) target bundleno = 329 (0x149), region = 32  ;;  %s450_s25 = sshll.u32 (!%p968_p7), %s882_s19, 3 }
  0x50   : > { %s200_s27 = scalar_lea.sflag (!%p968_p7), [#allocation3], %s882_s19  ;;  %s203_s4 = scalar_lea.vmem (!%p968_p7), [#allocation2], %s450_s25 }
  0x56   : > { %670 = dma.done.wait (%p969_p3), %s200_s27, 128  }
  0x57   : > { %672 = vsyncadd (%p969_p3), %s200_s27, 4294967168  ;;  %p970_p4 = scmp.ne.s32.totalorder %s958_s20, 0 }
  0x59   : > { %674 = dma.done.wait (%p970_p4), [#allocation6], 512  }
  0x5a   : > { %676 = vsyncadd (%p970_p4), [#allocation6], 4294966784  ;;  %v709_v0 = vmov 0.0|0.0   ;;  %vm710_vm0 = vmmov 0   ;;  %v711_v1 = vmov 0.0   ;;  %v237_v2 = vld [vmem:[#allocation5] sm:$0xff] }
  0x5b   : > { %475 = vmatprep.subr.bf16.mxu0 %v709_v0  ;;  %472 = vmatprep.mubr.msk.f32.mxu0 %vm710_vm0, %v711_v1  ;;  %v238_v3 = vld [vmem:[#allocation5 + $0x8] sm:$0xff]  ;;  %v239_v4 = vld [vmem:[#allocation5 + $0x10] sm:$0xff]  ;;  %v240_v6 = vld [vmem:[#allocation5 + $0x18] sm:$0xff]  ;;  %vm248_vm1 = vcmask 261120   ;;  %s456_s24 = sshll.u32 %s695_s15, 7  ;;  %s232_s9 = scalar_lea.vmem [#allocation7], %s450_s25 }
  0x5c   : > { %v476_v5 = vpack.c.bf16 %v238_v3, %v237_v2  ;;  %v479_v7 = vpack.c.bf16 %v240_v6, %v239_v4  ;;  %v236_v8 = vld [vmem:[%s203_s4] sm:$0xff]  ;;  %s338_s10 = sshll.u32 %s232_s9, 4  ;;  %s901_s29 = scalar_lea.hbm %s953_s3, %s456_s24  ;;  %s903_s10 = int_to_ptr.vmem [resolvable:$true] %s338_s10 }
  0x5d   : > { %v453_v9 = vld [vmem:[%s952_s2] ss:$0 sm:$0xff]  ;;  %s324_s6 = scalar_lea.sflag [#allocation4], %s882_s19  ;;  %s617_s26 = scalar_lea.vmem %s903_s10, 128 }
  0x5e   : > { %477 = vmatpush3.bf16.msra.mxu0 %v476_v5  ;;  %p618_p13 = scmp.ne.s32.totalorder %s903_s10, %s617_s26  ;;  %s712_s15 = smov [#allocation7]  }
  0x5f   : > { %478 = vmatprep.subr.bf16.mxu0 %v709_v0  ;;  %s621_s7 = sshll.u32 %s712_s15, 4  ;;  %s622_s7 = int_to_ptr.vmem [resolvable:$false] %s621_s7 }
  0x60   : > { %p619_p6 = pnand %p618_p13, %p829_p10  ;;  %s623_s8 = scalar_lea.vmem %s622_s7, 256 }
  0x61   : > { %p624_p12 = scmp.lt.s32.totalorder %s903_s10, %s622_s7  ;;  %p625_p11 = scmp.lt.s32.totalorder %s623_s8, %s617_s26 }
  0x62   : > { %480 = vmatpush3.bf16.msra.mxu0 %v479_v7  ;;  %p620_p8 = pneg %p619_p6 }
  0x63   : > { %p626_p0 = por %p625_p11, %p624_p12 }
  0x65   : > { %473 = vmatmul.mubr.msk.f32.vlgmr.msra.gmra.mrb[0].mxu0 %vm248_vm1, %v236_v8  ;;  %p627_p5 = pnand %p626_p0, %p620_p8 }
 0x138   : > { %v318_v10 = vpop.f32.mrb[0].mxu0 }
 0x139   : > { %v319_v11 = vadd.f32 %v453_v9, %v318_v10  ;;  %v474_v12 = vpop.f32.mrb[1].mxu0 }
 0x13b   : > { %322 = vst.msk [vmem:[%s232_s9] sm:$0xff] %vm248_vm1, %v319_v11 }
 0x13c   : > { %630 = shalt.err (!%p627_p5)
}
 0x13d   : > { %s631_s21 = scalar_lea.hbm %s901_s29, 128  ;;  %s635_s27 = scalar_lea.hbm %s953_s3, 256 }
 0x13e   : > { %p632_p9 = scmp.ne.s32.totalorder %s901_s29, %s631_s21  ;;  %p636_p7 = scmp.lt.u32.totalorder %s901_s29, %s953_s3 }
 0x13f   : > { %p637_p3 = scmp.lt.u32.totalorder %s635_s27, %s631_s21  ;;  %p639_p13 = scmp.lt.u32.totalorder %s631_s21, %s901_s29 }
 0x140   : > { %p633_p1 = pnand %p632_p9, %p829_p10 }
 0x141   : > { %p638_p4 = por %p637_p3, %p636_p7 }
 0x142   : > { %p634_p2 = pneg %p633_p1 }
 0x143   : > { %p640_p6 = por %p639_p13, %p638_p4 }
 0x145   : > { %p641_p8 = pnand %p640_p6, %p634_p2 }
 0x147   : > { %644 = shalt.err (!%p641_p8)
}
 0x148   : > { %487 = dma.vmem_to_hbm [thread:$0]  (%p829_p10), %s903_s10, 128, %s901_s29, %s324_s6  }
 0x149 PF: > { %s350_s22 = sand.u32 1, %s683_s12   ;;  %p971_p12 = scmp.ne.s32.totalorder %s961_s23, 0 }
 0x14a   : > { %p972_p11 = scmp.ge.s32.totalorder %s703_s17, 2  ;;  %s351_s24 = scalar_lea.sflag [#allocation4], %s350_s22 }
 0x14c   : > { %p498_p0 = pnand %p972_p11, %p971_p12 }
 0x14e   : > { %678 = dma.done.wait (!%p498_p0), %s351_s24, 128  }
 0x14f   : > { %680 = vsyncadd (!%p498_p0), %s351_s24, 4294967168  ;;  %s20_s17 = sadd.s32 1, %s703_s17   ;;  %s973_s12 = smov %s687_s13 }
 0x150   : > { %p17_p5 = scmp.ge.s32.totalorder %s20_s17, 4   ;;  %s974_s13 = smov %s691_s14 }
 0x151   : > { %s975_s14 = smov %s838_s5  ;;  %s976_s15 = smov %s699_s16 }
 0x152   : > { %s977_s16 = smov %s979_s28  ;;  %19 = sbr.rel (!%p17_p5) target bundleno = 7 (0x7), region = 85 }
 0x159   :  { %356 = vsyncpa [#allocation3], 1 }
 0x15a   :  { %358 = vsyncpa [#allocation3 + $0x1], 1 }
 0x15b   :  { %359 = vsyncpa [#allocation6], 1 }
 0x15c   :  { %360 = vsyncpa [#allocation4], 1 }
 0x15d   :  { %362 = vsyncpa [#allocation4 + $0x1], 1 }

</bundles_post_ra>
